<compile_context>
chip_gen: v7x
topology: tpu7x:2x2x1
jax: 0.10.0
libtpu: 0.0.40
codegen_flags: <defaults>
</compile_context>

<pallas_src>
import functools

import jax
import jax.numpy as jnp
import numpy as np
from jax.experimental import pallas as pl
from jax.experimental.pallas import tpu as pltpu


def _round_up(x, m):
    return (x + m - 1) // m * m


def autoencoder_kernel(x_ref,
                       w1_ref, b1_ref,
                       w2_ref, b2_ref,
                       w3_ref, b3_ref,
                       w4_ref, b4_ref,
                       out_ref):
    x = x_ref[...]

    # encoder
    h1 = jnp.dot(x, w1_ref[...], preferred_element_type=jnp.float32) + b1_ref[...]
    h1 = jnp.maximum(h1, 0.0)
    z = jnp.dot(h1, w2_ref[...], preferred_element_type=jnp.float32) + b2_ref[...]
    z = jnp.maximum(z, 0.0)

    # decoder
    h2 = jnp.dot(z, w3_ref[...], preferred_element_type=jnp.float32) + b3_ref[...]
    h2 = jnp.maximum(h2, 0.0)
    y = jnp.dot(h2, w4_ref[...], preferred_element_type=jnp.float32) + b4_ref[...]
    y = jnp.maximum(y, 0.0)

    out_ref[...] = y.astype(out_ref.dtype)


@functools.partial(jax.jit, static_argnames=("tb",))
def autoencoder_forward(x, params, *, tb=4096):
    """x: (B, input_size) float32. params: dict of (in,out) weights / (1,out) biases."""
    B, input_size = x.shape
    hidden = params["w1"].shape[1]
    latent = params["w2"].shape[1]
    dtype = x.dtype

    # Batch tile: force a multiple of 8 sublanes; collapse to one step for tiny B.
    tb = max(8, (int(tb) // 8) * 8)
    b_pad = _round_up(B, 8)          # pad batch to sublanes only, never to tb
    tb = min(tb, b_pad)
    grid = (pl.cdiv(b_pad, tb),)     # partial trailing block: OOB rows are masked

    # Only pad the batch dim when B is not sublane-aligned (no-op in common case).
    x_in = x if b_pad == B else jnp.zeros((b_pad, input_size), dtype).at[:B].set(x)

    w1, b1 = params["w1"], params["b1"]
    w2, b2 = params["w2"], params["b2"]
    w3, b3 = params["w3"], params["b3"]
    w4, b4 = params["w4"], params["b4"]

    # x/out tiles stream over the grid; weights/biases stay VMEM-resident.
    act_spec = pl.BlockSpec((tb, input_size), lambda i: (i, 0))

    def resident(arr):
        return pl.BlockSpec(arr.shape, lambda i: (0, 0))

    itemsize = jnp.dtype(dtype).itemsize
    weight_bytes = sum(int(a.size) * itemsize
                       for a in (w1, b1, w2, b2, w3, b3, w4, b4))
    cost = pl.CostEstimate(
        flops=2 * b_pad * (input_size * hidden + hidden * latent
                           + latent * hidden + hidden * input_size),
        transcendentals=0,
        bytes_accessed=2 * b_pad * input_size * itemsize + weight_bytes,
    )

    out = pl.pallas_call(
        autoencoder_kernel,
        out_shape=jax.ShapeDtypeStruct((b_pad, input_size), dtype),
        grid=grid,
        in_specs=[act_spec,
                  resident(w1), resident(b1),
                  resident(w2), resident(b2),
                  resident(w3), resident(b3),
                  resident(w4), resident(b4)],
        out_specs=act_spec,
        compiler_params=pltpu.CompilerParams(
            dimension_semantics=("parallel",),
            vmem_limit_bytes=32 * 1024 * 1024),
        cost_estimate=cost,
    )(x_in, w1, b1, w2, b2, w3, b3, w4, b4)

    # TODO(synk): carry x/out (and weights) in bf16 to halve HBM traffic on very
    # large batches (accumulation is already f32); needs a looser tolerance at
    # the call site, so the default path stays f32.
    return out if b_pad == B else out[:B]


def init_params(key, input_size=100, hidden_size=10, latent_size=2):
    """Deterministic init mimicking torch.nn.Linear default (uniform +-1/sqrt(fan_in))."""
    dims = [(input_size, hidden_size),
            (hidden_size, latent_size),
            (latent_size, hidden_size),
            (hidden_size, input_size)]
    params = {}
    keys = jax.random.split(key, 2 * len(dims))
    for i, (fan_in, fan_out) in enumerate(dims):
        bound = 1.0 / np.sqrt(fan_in)
        w = jax.random.uniform(keys[2 * i], (fan_in, fan_out),
                               minval=-bound, maxval=bound, dtype=jnp.float32)
        b = jax.random.uniform(keys[2 * i + 1], (1, fan_out),
                               minval=-bound, maxval=bound, dtype=jnp.float32)
        params[f"w{i+1}"] = w
        params[f"b{i+1}"] = b
    return params


def autoencoder_ref(x, p):
    """Pure-JAX reference of the same forward pass (for verification)."""
    h = jnp.maximum(x @ p["w1"] + p["b1"], 0.0)
    z = jnp.maximum(h @ p["w2"] + p["b2"], 0.0)
    d = jnp.maximum(z @ p["w3"] + p["b3"], 0.0)
    y = jnp.maximum(d @ p["w4"] + p["b4"], 0.0)
    return y


if __name__ == "__main__":
    key = jax.random.PRNGKey(0)
    k_param, k_x = jax.random.split(key)

    input_size, hidden_size, latent_size = 100, 10, 2
    batch = 8

    params = init_params(k_param, input_size, hidden_size, latent_size)
    x = jax.random.normal(k_x, (batch, input_size), dtype=jnp.float32)

    out = autoencoder_forward(x, params)
    out = jax.block_until_ready(out)

    ref = autoencoder_ref(x, params)
    np.testing.assert_allclose(np.asarray(out), np.asarray(ref),
                               rtol=1e-4, atol=1e-5)

    print("KERNEL_OK")
</pallas_src>

<mosaic_0001>
module attributes {stable_mosaic.version = 11 : i64} {
  func.func @autoencoder_kernel(%arg0: i32, %arg1: memref<8x100xf32, #tpu.memory_space<vmem>>, %arg2: memref<100x10xf32, #tpu.memory_space<vmem>>, %arg3: memref<1x10xf32, #tpu.memory_space<vmem>>, %arg4: memref<10x2xf32, #tpu.memory_space<vmem>>, %arg5: memref<1x2xf32, #tpu.memory_space<vmem>>, %arg6: memref<2x10xf32, #tpu.memory_space<vmem>>, %arg7: memref<1x10xf32, #tpu.memory_space<vmem>>, %arg8: memref<10x100xf32, #tpu.memory_space<vmem>>, %arg9: memref<1x100xf32, #tpu.memory_space<vmem>>, %arg10: memref<8x100xf32, #tpu.memory_space<vmem>>) attributes {dimension_semantics = [#tpu.dimension_semantics<parallel>], iteration_bounds = array<i64: 1>, scalar_prefetch = 0 : i64, scratch_operands = 0 : i64, tpu.core_type = #tpu.core_type<tc>, window_params = [{transform_indices = @transform_0, window_bounds = array<i64: 8, 100>}, {pipeline_mode = #tpu.pipeline_mode<synchronous>, transform_indices = @transform_1, window_bounds = array<i64: 100, 10>}, {pipeline_mode = #tpu.pipeline_mode<synchronous>, transform_indices = @transform_2, window_bounds = array<i64: 1, 10>}, {pipeline_mode = #tpu.pipeline_mode<synchronous>, transform_indices = @transform_3, window_bounds = array<i64: 10, 2>}, {pipeline_mode = #tpu.pipeline_mode<synchronous>, transform_indices = @transform_4, window_bounds = array<i64: 1, 2>}, {pipeline_mode = #tpu.pipeline_mode<synchronous>, transform_indices = @transform_5, window_bounds = array<i64: 2, 10>}, {pipeline_mode = #tpu.pipeline_mode<synchronous>, transform_indices = @transform_6, window_bounds = array<i64: 1, 10>}, {pipeline_mode = #tpu.pipeline_mode<synchronous>, transform_indices = @transform_7, window_bounds = array<i64: 10, 100>}, {pipeline_mode = #tpu.pipeline_mode<synchronous>, transform_indices = @transform_8, window_bounds = array<i64: 1, 100>}, {transform_indices = @transform_9, window_bounds = array<i64: 8, 100>}]} {
    %c0 = arith.constant 0 : index
    %c0_0 = arith.constant 0 : index
    %0 = vector.load %arg1[%c0, %c0_0] : memref<8x100xf32, #tpu.memory_space<vmem>>, vector<8x100xf32>
    %c0_1 = arith.constant 0 : index
    %c0_2 = arith.constant 0 : index
    %1 = vector.load %arg2[%c0_1, %c0_2] : memref<100x10xf32, #tpu.memory_space<vmem>>, vector<100x10xf32>
    %cst = arith.constant dense<0.000000e+00> : vector<8x10xf32>
    %2 = tpu.matmul %0, %1, %cst {dimension_numbers = #tpu.dot_dimension_numbers<[1], [0], [0], [1], [0, 0, 1, 1], [], []>} : vector<8x100xf32>, vector<100x10xf32>, vector<8x10xf32> -> vector<8x10xf32>
    %c0_3 = arith.constant 0 : index
    %c0_4 = arith.constant 0 : index
    %3 = vector.load %arg3[%c0_3, %c0_4] : memref<1x10xf32, #tpu.memory_space<vmem>>, vector<1x10xf32>
    %4 = vector.broadcast %3 : vector<1x10xf32> to vector<8x10xf32>
    %5 = arith.addf %2, %4 : vector<8x10xf32>
    %cst_5 = arith.constant 0.000000e+00 : f32
    %6 = vector.broadcast %cst_5 : f32 to vector<8x10xf32>
    %7 = arith.maximumf %5, %6 : vector<8x10xf32>
    %c0_6 = arith.constant 0 : index
    %c0_7 = arith.constant 0 : index
    %8 = vector.load %arg4[%c0_6, %c0_7] : memref<10x2xf32, #tpu.memory_space<vmem>>, vector<10x2xf32>
    %cst_8 = arith.constant dense<0.000000e+00> : vector<8x2xf32>
    %9 = tpu.matmul %7, %8, %cst_8 {dimension_numbers = #tpu.dot_dimension_numbers<[1], [0], [0], [1], [0, 0, 1, 1], [], []>} : vector<8x10xf32>, vector<10x2xf32>, vector<8x2xf32> -> vector<8x2xf32>
    %c0_9 = arith.constant 0 : index
    %c0_10 = arith.constant 0 : index
    %10 = vector.load %arg5[%c0_9, %c0_10] : memref<1x2xf32, #tpu.memory_space<vmem>>, vector<1x2xf32>
    %11 = vector.broadcast %10 : vector<1x2xf32> to vector<8x2xf32>
    %12 = arith.addf %9, %11 : vector<8x2xf32>
    %cst_11 = arith.constant 0.000000e+00 : f32
    %13 = vector.broadcast %cst_11 : f32 to vector<8x2xf32>
    %14 = arith.maximumf %12, %13 : vector<8x2xf32>
    %c0_12 = arith.constant 0 : index
    %c0_13 = arith.constant 0 : index
    %15 = vector.load %arg6[%c0_12, %c0_13] : memref<2x10xf32, #tpu.memory_space<vmem>>, vector<2x10xf32>
    %cst_14 = arith.constant dense<0.000000e+00> : vector<8x10xf32>
    %16 = tpu.matmul %14, %15, %cst_14 {dimension_numbers = #tpu.dot_dimension_numbers<[1], [0], [0], [1], [0, 0, 1, 1], [], []>} : vector<8x2xf32>, vector<2x10xf32>, vector<8x10xf32> -> vector<8x10xf32>
    %c0_15 = arith.constant 0 : index
    %c0_16 = arith.constant 0 : index
    %17 = vector.load %arg7[%c0_15, %c0_16] : memref<1x10xf32, #tpu.memory_space<vmem>>, vector<1x10xf32>
    %18 = vector.broadcast %17 : vector<1x10xf32> to vector<8x10xf32>
    %19 = arith.addf %16, %18 : vector<8x10xf32>
    %cst_17 = arith.constant 0.000000e+00 : f32
    %20 = vector.broadcast %cst_17 : f32 to vector<8x10xf32>
    %21 = arith.maximumf %19, %20 : vector<8x10xf32>
    %c0_18 = arith.constant 0 : index
    %c0_19 = arith.constant 0 : index
    %22 = vector.load %arg8[%c0_18, %c0_19] : memref<10x100xf32, #tpu.memory_space<vmem>>, vector<10x100xf32>
    %cst_20 = arith.constant dense<0.000000e+00> : vector<8x100xf32>
    %23 = tpu.matmul %21, %22, %cst_20 {dimension_numbers = #tpu.dot_dimension_numbers<[1], [0], [0], [1], [0, 0, 1, 1], [], []>} : vector<8x10xf32>, vector<10x100xf32>, vector<8x100xf32> -> vector<8x100xf32>
    %c0_21 = arith.constant 0 : index
    %c0_22 = arith.constant 0 : index
    %24 = vector.load %arg9[%c0_21, %c0_22] : memref<1x100xf32, #tpu.memory_space<vmem>>, vector<1x100xf32>
    %25 = vector.broadcast %24 : vector<1x100xf32> to vector<8x100xf32>
    %26 = arith.addf %23, %25 : vector<8x100xf32>
    %cst_23 = arith.constant 0.000000e+00 : f32
    %27 = vector.broadcast %cst_23 : f32 to vector<8x100xf32>
    %28 = arith.maximumf %26, %27 : vector<8x100xf32>
    %c0_24 = arith.constant 0 : index
    %c0_25 = arith.constant 0 : index
    %29 = vector.load %arg10[%c0_24, %c0_25] : memref<8x100xf32, #tpu.memory_space<vmem>>, vector<8x100xf32>
    tpu.vector_store %arg10[%c0_24, %c0_25], %28 {strides = array<i32>} : memref<8x100xf32, #tpu.memory_space<vmem>>, vector<8x100xf32>,
    return
  }
  func.func @transform_0(%arg0: i32) -> (i32, i32) {
    %c0_i32 = arith.constant 0 : i32
    %c0_i32_0 = arith.constant 0 : i32
    return %arg0, %c0_i32 : i32, i32
  }
  func.func @transform_1(%arg0: i32) -> (i32, i32) {
    %c0_i32 = arith.constant 0 : i32
    %c0_i32_0 = arith.constant 0 : i32
    %c0_i32_1 = arith.constant 0 : i32
    return %c0_i32, %c0_i32_0 : i32, i32
  }
  func.func @transform_2(%arg0: i32) -> (i32, i32) {
    %c0_i32 = arith.constant 0 : i32
    %c0_i32_0 = arith.constant 0 : i32
    %c0_i32_1 = arith.constant 0 : i32
    return %c0_i32, %c0_i32_0 : i32, i32
  }
  func.func @transform_3(%arg0: i32) -> (i32, i32) {
    %c0_i32 = arith.constant 0 : i32
    %c0_i32_0 = arith.constant 0 : i32
    %c0_i32_1 = arith.constant 0 : i32
    return %c0_i32, %c0_i32_0 : i32, i32
  }
  func.func @transform_4(%arg0: i32) -> (i32, i32) {
    %c0_i32 = arith.constant 0 : i32
    %c0_i32_0 = arith.constant 0 : i32
    %c0_i32_1 = arith.constant 0 : i32
    return %c0_i32, %c0_i32_0 : i32, i32
  }
  func.func @transform_5(%arg0: i32) -> (i32, i32) {
    %c0_i32 = arith.constant 0 : i32
    %c0_i32_0 = arith.constant 0 : i32
    %c0_i32_1 = arith.constant 0 : i32
    return %c0_i32, %c0_i32_0 : i32, i32
  }
  func.func @transform_6(%arg0: i32) -> (i32, i32) {
    %c0_i32 = arith.constant 0 : i32
    %c0_i32_0 = arith.constant 0 : i32
    %c0_i32_1 = arith.constant 0 : i32
    return %c0_i32, %c0_i32_0 : i32, i32
  }
  func.func @transform_7(%arg0: i32) -> (i32, i32) {
    %c0_i32 = arith.constant 0 : i32
    %c0_i32_0 = arith.constant 0 : i32
    %c0_i32_1 = arith.constant 0 : i32
    return %c0_i32, %c0_i32_0 : i32, i32
  }
  func.func @transform_8(%arg0: i32) -> (i32, i32) {
    %c0_i32 = arith.constant 0 : i32
    %c0_i32_0 = arith.constant 0 : i32
    %c0_i32_1 = arith.constant 0 : i32
    return %c0_i32, %c0_i32_0 : i32, i32
  }
  func.func @transform_9(%arg0: i32) -> (i32, i32) {
    %c0_i32 = arith.constant 0 : i32
    %c0_i32_0 = arith.constant 0 : i32
    return %arg0, %c0_i32 : i32, i32
  }
}

</mosaic_0001>

<bundles_post_ra>
// kernel: autoencoder_forward.1
= control target key start
LH: loop header
LB: loop body
LE: loop exit
PB: predicated region body
PF: predicated region fallthrough
CT: control target
= control target key end

     0   :  { %v545_v3 = vmov 0.0|0.0   ;;  %vm546_vm0 = vmmov 0   ;;  %v547_v6 = vmov 0.0   ;;  %s697_s0 = inlined_call_operand.vmem [shape: f32[8,100], index: 0, kind: input, shape index: {}]   ;;  %s698_s1 = inlined_call_operand.vmem [shape: f32[100,10], index: 1, kind: input, shape index: {}]   ;;  %s699_s2 = inlined_call_operand.vmem [shape: f32[1,10], index: 2, kind: input, shape index: {}]   ;;  %s700_s3 = inlined_call_operand.vmem [shape: f32[10,2], index: 3, kind: input, shape index: {}]   ;;  %s701_s4 = inlined_call_operand.vmem [shape: f32[1,2], index: 4, kind: input, shape index: {}]   ;;  %s702_s5 = inlined_call_operand.vmem [shape: f32[2,10], index: 5, kind: input, shape index: {}]   ;;  %s703_s6 = inlined_call_operand.vmem [shape: f32[1,10], index: 6, kind: input, shape index: {}]   ;;  %s704_s7 = inlined_call_operand.vmem [shape: f32[10,100], index: 7, kind: input, shape index: {}]   ;;  %s705_s8 = inlined_call_operand.vmem [shape: f32[1,100], index: 8, kind: input, shape index: {}]   ;;  %s706_s9 = inlined_call_operand.hbm [shape: f32[8,100], index: 9, kind: output, shape index: {}]  }
   0x1   :  { %v34_v0 = vld [vmem:[%s698_s1] sm:$0xff]  ;;  %v35_v1 = vld [vmem:[%s698_s1 + $0x8] sm:$0xff]  ;;  %v36_v2 = vld [vmem:[%s698_s1 + $0x10] sm:$0xff]  ;;  %490 = vmatprep.subr.bf16.mxu0 %v545_v3  ;;  %508 = vmatprep.subr.bf16.mxu1 %v545_v3 }
   0x2   :  { %v491_v4 = vpack.c.bf16 %v35_v1, %v34_v0  ;;  %v37_v5 = vld [vmem:[%s698_s1 + $0x18] sm:$0xff]  ;;  %468 = vmatprep.mubr.msk.f32.mxu0 %vm546_vm0, %v547_v6  ;;  %475 = vmatprep.mubr.msk.f32.mxu1 %vm546_vm0, %v547_v6  ;;  %v38_v8 = vld [vmem:[%s698_s1 + $0x20] sm:$0xff]  ;;  %v39_v9 = vld [vmem:[%s698_s1 + $0x28] sm:$0xff] }
   0x3   :  { %v494_v7 = vpack.c.bf16 %v37_v5, %v36_v2 }
   0x4   :  { %492 = vmatpush3.bf16.msra.mxu0 %v491_v4 }
   0x5   :  { %493 = vmatprep.subr.bf16.mxu0 %v545_v3 }
   0x6   :  { %14 = vsyncpa [#allocation3], 0  ;;  %v497_v10 = vpack.c.bf16 %v39_v9, %v38_v8  ;;  %v40_v11 = vld [vmem:[%s698_s1 + $0x30] sm:$0xff]  ;;  %v41_v12 = vld [vmem:[%s698_s1 + $0x38] sm:$0xff]  ;;  %vm58_vm1 = vcmask 1043456   ;;  %vm54_vm2 = vcmask 818176  }
   0x7   :  { %v500_v13 = vpack.c.bf16 %v41_v12, %v40_v11  ;;  %v42_v14 = vld [vmem:[%s698_s1 + $0x40] sm:$0xff]  ;;  %v43_v15 = vld [vmem:[%s698_s1 + $0x48] sm:$0xff]  ;;  %v44_v17 = vld [vmem:[%s698_s1 + $0x50] sm:$0xff]  ;;  %vm146_vm3 = vcmask 1041408   ;;  %vm548_vm4 = vmmov 1   ;;  %vm142_vm6 = vcmask 80896  }
   0x8   :  { %495 = vmatpush3.bf16.msra.mxu0 %v494_v7  ;;  %v503_v16 = vpack.c.bf16 %v43_v15, %v42_v14  ;;  %v45_v18 = vld [vmem:[%s698_s1 + $0x58] sm:$0xff]  ;;  %v46_v20 = vld [vmem:[%s698_s1 + $0x60] sm:$0xf]  ;;  %v134_v23 = vld [vmem:[%s700_s3 + $0x8] sm:$0x3]  ;;  %vm229_vm7 = vcmask 15360  }
   0x9   :  { %496 = vmatprep.subr.bf16.mxu0 %v545_v3  ;;  %v506_v19 = vpack.c.bf16 %v45_v18, %v44_v17  ;;  %v33_v21 = vld [vmem:[%s697_s0] sm:$0xff]  ;;  %vm651_vm5 = vmpackc.low %vm146_vm3, %vm548_vm4  ;;  %v308_v38 = vld [vmem:[%s704_s7 + $0x8] sm:$0x3] }
   0xa   :  { %v133_v22 = vld [vmem:[%s700_s3] sm:$0xff] }
   0xb   :  { %v509_v24 = vpack.c.bf16 %v134_v23, %v133_v22  ;;  %v408_v26 = vld [vmem:[%s699_s2] ss:$0 sm:$0xff] }
   0xc   :  { %498 = vmatpush3.bf16.msra.mxu0 %v497_v10  ;;  %v221_v31 = vld [vmem:[%s702_s5] sm:$0x3] }
   0xd   :  { %499 = vmatprep.subr.bf16.mxu0 %v545_v3  ;;  %511 = vmatpush3.bf16.msk.msra.mxu1 %vm651_vm5, %v509_v24  ;;  %v411_v32 = vld [vmem:[%s701_s4] ss:$0 sm:$0xff] }
   0xe   :  { %478 = vmatprep.subr.mxu1 %v547_v6  ;;  %v307_v37 = vld [vmem:[%s704_s7] sm:$0xff]  ;;  %s549_s7 = smov [#allocation2]  }
   0xf   :  { %v513_v39 = vpack.c.bf16 %v308_v38, %v307_v37  ;;  %v414_v40 = vld [vmem:[%s703_s6] ss:$0 sm:$0xff]  ;;  %s400_s28 = sshll.u32 %s549_s7, 4  ;;  %s401_s28 = int_to_ptr.vmem [resolvable:$true] %s400_s28 }
  0x10   :  { %501 = vmatpush3.bf16.msra.mxu0 %v500_v13  ;;  %v417_v45 = vld [vmem:[%s705_s8] ss:$0 sm:$0xff]  ;;  %s521_s6 = scalar_lea.vmem %s401_s28, 128  ;;  %p526_p1 = scmp.lt.s32.totalorder %s401_s28, %s401_s28 }
  0x11   :  { %502 = vmatprep.subr.bf16.mxu0 %v545_v3  ;;  %p522_p0 = scmp.ne.s32.totalorder %s401_s28, %s521_s6  ;;  %p527_p2 = scmp.lt.s32.totalorder %s521_s6, %s521_s6 }
  0x13   :  { %p528_p3 = por %p527_p2, %p526_p1 }
  0x14   :  { %504 = vmatpush3.bf16.msra.mxu0 %v503_v16 }
  0x15   :  { %505 = vmatprep.subr.bf16.mxu0 %v545_v3  ;;  %p529_p4 = pnand %p528_p3, %p522_p0 }
  0x18   :  { %507 = vmatpush3.bf16.msra.mxu0 %v506_v19 }
  0x19   :  { %466 = vmatprep.subr.mxu0 %v547_v6 }
  0x1c   :  { %467 = vmatpush3.msk.msra.mxu0 %vm58_vm1, %v46_v20 }
  0x1d   :  { %469 = vmatmul.mubr.msk.f32.vlgmr.msra.gmra.mrb[0].mxu0 %vm54_vm2, %v33_v21 }
  0xf0   :  { %v128_v27 = vpop.f32.mrb[0].mxu0 }
  0xf1   :  { %v129_v28 = vadd.f32 %v408_v26, %v128_v27  ;;  %v470_v29 = vpop.f32.mrb[1].mxu0 }
  0xf3   :  { %v132_v30 = vmax.f32 %v129_v28, 0.0 }
  0xf5   :  { %476 = vmatmul.mubr.msk.f32.vlgmr.msra.gmra.mrb[0].mxu1 %vm142_vm6, %v132_v30 }
  0xf6   :  { %480 = vmatprep.mubr.msk.f32.mxu1 %vm546_vm0, %v547_v6  ;;  %479 = vmatpush3.msk.msra.mxu1 %vm146_vm3, %v221_v31 }
  0xf7   :  { %512 = vmatprep.subr.bf16.mxu1 %v545_v3 }
 0x1c8   :  { %v216_v33 = vpop.f32.mrb[0].mxu1 }
 0x1c9   :  { %v217_v34 = vadd.f32 %v411_v32, %v216_v33  ;;  %v477_v35 = vpop.f32.mrb[1].mxu1 }
 0x1cb   :  { %v220_v36 = vmax.f32 %v217_v34, 0.0 }
 0x1cd   :  { %481 = vmatmul.mubr.msk.f32.vlgmr.msra.gmra.mrb[2].mxu1 %vm229_vm7, %v220_v36 }
 0x1ce   :  { %487 = vmatprep.mubr.msk.f32.mxu1 %vm546_vm0, %v547_v6  ;;  %515 = vmatpush3.bf16.msk.msra.mxu1 %vm651_vm5, %v513_v39 }
 0x2a0   :  { %v302_v41 = vpop.f32.mrb[2].mxu1 }
 0x2a1   :  { %v303_v42 = vadd.f32 %v414_v40, %v302_v41  ;;  %v482_v43 = vpop.f32.mrb[3].mxu1 }
 0x2a3   :  { %v306_v44 = vmax.f32 %v303_v42, 0.0 }
 0x2a5   :  { %488 = vmatmul.mubr.msk.f32.vlgmr.msra.gmra.mrb[4].mxu1 %vm142_vm6, %v306_v44 }
 0x378   :  { %v388_v46 = vpop.f32.mrb[4].mxu1 }
 0x379   :  { %v389_v47 = vadd.f32 %v417_v45, %v388_v46  ;;  %v489_v48 = vpop.f32.mrb[5].mxu1 }
 0x37b   :  { %v392_v49 = vmax.f32 %v389_v47, 0.0 }
 0x37d   :  { %393 = vst.msk [vmem:[#allocation2] sm:$0xff] %vm54_vm2, %v392_v49 }
 0x37e   :  { %532 = shalt.err (!%p529_p4)
}
 0x37f   :  { %s533_s8 = scalar_lea.hbm %s706_s9, 128 }
 0x380   :  { %p534_p5 = scmp.ne.s32.totalorder %s706_s9, %s533_s8  ;;  %p537_p6 = scmp.lt.u32.totalorder %s533_s8, %s706_s9 }
 0x382   :  { %p539_p7 = pnand %p537_p6, %p534_p5 }
 0x384   :  { %542 = shalt.err (!%p539_p7)
}
 0x385   :  { %403 = dma.vmem_to_hbm [thread:$0]  %s401_s28, 128, %s706_s9, [#allocation3]  }
 0x386   :  { %543 = dma.done.wait [#allocation3], 128  }
 0x387   :  { %544 = vsyncadd [#allocation3], 4294967168 }
 0x388   :  { %407 = vsyncpa [#allocation3], 1 }

</bundles_post_ra>
